<compile_context>
chip_gen: v6e
topology: v6e:2x2x1
jax: 0.10.0
libtpu: 0.0.40
codegen_flags: <defaults>
</compile_context>

<pallas_src>
import functools

import jax
import jax.numpy as jnp
from jax.experimental import pallas as pl
from jax.experimental.pallas import tpu as pltpu


# ----------------------------------------------------------------------------
# kernel body
# ----------------------------------------------------------------------------
def _ensemble_kernel(w_ref, k_ref, o_ref, *, kc: int, n_k_steps: int):
    """Weighted sum of a kc-chunk of base kernels for one (tm, tn) output tile.

    w_ref : SMEM (n,)          float32 mixture weights
    k_ref : VMEM (kc, tm, tn)  float32 / bfloat16 base-kernel slab
    o_ref : VMEM (tm, tn)      float32 output tile (doubles as the reduction
                               accumulator when the kernel axis is chunked)
    """
    if n_k_steps == 1:
        # Whole kernel axis in one step: straight fused weighted sum.
        acc = w_ref[0] * k_ref[0].astype(jnp.float32)
        for i in range(1, kc):
            acc = acc + w_ref[i] * k_ref[i].astype(jnp.float32)
        o_ref[...] = acc
    else:
        kk = pl.program_id(1)            # trailing "arbitrary" reduction axis
        base = kk * kc                   # kc divides n -> always in bounds
        acc = w_ref[base] * k_ref[0].astype(jnp.float32)
        for i in range(1, kc):
            acc = acc + w_ref[base + i] * k_ref[i].astype(jnp.float32)

        # Accumulate directly into the f32 output block: the same (i) output
        # block is revisited for every k step, so it stays VMEM-resident and
        # is only written back to HBM once per row slab.
        @pl.when(kk == 0)
        def _():
            o_ref[...] = acc

        @pl.when(kk > 0)
        def _():
            o_ref[...] = o_ref[...] + acc


# ----------------------------------------------------------------------------
# tiling helpers (trace-time, plain python ints)
# ----------------------------------------------------------------------------
def _cdiv(a: int, b: int) -> int:
    return -(-a // b)


def _round_up(x: int, m: int) -> int:
    return _cdiv(x, m) * m


def _round_down(x: int, m: int) -> int:
    return max(m, (x // m) * m)


def _choose_row_tiling(N: int, tm_cap: int):
    """Pick (tm, grid_rows): tm a multiple of 8, <= tm_cap, with an even
    (>= 2) and balanced number of row blocks whenever N > 8 rows, so both of
    v7x's TensorCores get work (the extra split is free on single-TC chips)."""
    n_sub = _round_up(N, 8)
    tm = min(max(8, tm_cap), n_sub)
    gi = _cdiv(N, tm)
    if n_sub <= 8:
        return tm, gi
    best = None
    for g in range(max(2, gi - 1), gi + 8):
        t = min(n_sub, max(8, _round_up(_cdiv(N, g), 8)))
        if t > tm:                       # never exceed the VMEM-derived cap
            continue
        g_eff = _cdiv(N, t)
        # prefer an even block count, close to the requested count, big tiles
        key = (g_eff % 2, abs(g_eff - gi), -t)
        if best is None or key < best[0]:
            best = (key, t, g_eff)
    if best is not None:
        return best[1], best[2]
    return tm, gi


# ----------------------------------------------------------------------------
# wrapper
# ----------------------------------------------------------------------------
def ensemble_kernels_forward(weights: jax.Array, kernels: jax.Array, *,
                             target_step_bytes: int = 4 << 20,
                             max_step_bytes: int = 8 << 20) -> jax.Array:
    """weights: [n] float, kernels: [n, N, N] float32/bfloat16 -> [N, N] float32.

    Deployment note: the op is read-bandwidth bound in n*N*N input bytes.  If
    the base kernels are reused across many forward calls, cast them to
    bfloat16 once on the caller side for a ~2x speedup on all TPU generations
    (accumulation and the returned ensemble kernel stay float32).
    """
    assert kernels.ndim == 3 and kernels.shape[1] == kernels.shape[2], \
        "kernels must be stacked [n, N, N] square similarity matrices"
    n, N, _ = kernels.shape
    assert weights.shape == (n,)
    weights = weights.astype(jnp.float32)
    isz = jnp.dtype(kernels.dtype).itemsize

    tn = N                      # full row per block: lane-dense, 1 block along lanes
    n_lane = _round_up(N, 128)  # padded lane extent (for VMEM accounting only)
    row_bytes = N * isz         # one row of one base kernel
    fkr_bytes = n * row_bytes   # one row across the whole kernel axis

    # ---- choose the kernel-axis chunk kc (always an exact divisor of n) ----
    if 8 * fkr_bytes <= max_step_bytes:
        # whole kernel axis fused into every grid step
        kc = n
        tm_cap = _round_down(max(target_step_bytes // fkr_bytes, 8), 8)
    else:
        # chunk the kernel axis: largest divisor of n that keeps an 8-row
        # step within budget (falls back to 1 kernel/step for enormous rows)
        kc = 1
        for d in range(1, n + 1):
            if n % d == 0 and d * 8 * row_bytes <= max_step_bytes:
                kc = d
        tm_cap = _round_down(max(max_step_bytes // (kc * row_bytes), 8), 8)

    tm, grid_rows = _choose_row_tiling(N, tm_cap)
    n_k_steps = n // kc
    grid = (grid_rows, n_k_steps)

    # ---- VMEM budget: double-buffered input slab + f32 output tile ---------
    step_in_bytes = kc * tm * n_lane * isz
    out_bytes = tm * n_lane * 4
    footprint = 2 * step_in_bytes + 2 * out_bytes
    # Small tiles keep this far below v7x's 64 MiB/TC; cap at 48 MiB for headroom.
    vmem_limit = int(min(48 << 20, max(24 << 20, footprint + (8 << 20))))

    kernel_fn = functools.partial(_ensemble_kernel, kc=kc, n_k_steps=n_k_steps)

    return pl.pallas_call(
        kernel_fn,
        out_shape=jax.ShapeDtypeStruct((N, N), jnp.float32),
        grid_spec=pltpu.PrefetchScalarGridSpec(
            num_scalar_prefetch=0,
            grid=grid,
            in_specs=[
                pl.BlockSpec(memory_space=pltpu.MemorySpace.SMEM),    # weights
                pl.BlockSpec((kc, tm, tn), lambda i, k: (k, i, 0)),   # kernels
            ],
            out_specs=pl.BlockSpec((tm, tn), lambda i, k: (i, 0)),
            scratch_shapes=(),
        ),
        compiler_params=pltpu.CompilerParams(
            dimension_semantics=("parallel", "arbitrary"),
            vmem_limit_bytes=vmem_limit),
    )(weights, kernels)


# ----------------------------------------------------------------------------
# parameter construction mirroring __init__ (host-side, plain JAX)
# ----------------------------------------------------------------------------
def init_ensemble_params(key, n_kernels: int, N: int, init_type="uniform"):
    """Deterministic in-script parameter construction mirroring __init__.

    'uniform', 'random' (Dirichlet) and explicit-list inits are supported.
    # TODO(synk): 'eigen'/'eigen_inv' init needs scipy.sparse.csgraph.laplacian
    # + scipy.linalg.eigh on the host; it is an init-time step, not forward.
    """
    k_key, w_key = jax.random.split(key)
    # synthetic symmetric PSD-ish similarity kernels, stacked [n, N, N]
    base = jax.random.normal(k_key, (n_kernels, N, N), dtype=jnp.float32)
    kernels = jnp.einsum("nij,nkj->nik", base, base) / N  # symmetric

    if init_type == "uniform":
        weights = jnp.ones((n_kernels,), dtype=jnp.float32) / n_kernels
    elif init_type == "random":
        weights = jax.random.dirichlet(
            w_key, jnp.ones((n_kernels,), jnp.float32)).astype(jnp.float32)
    elif isinstance(init_type, (list, tuple)):
        weights = jnp.asarray(init_type, dtype=jnp.float32)
    else:
        raise ValueError("Init_type is wrong.")
    return weights, kernels


def _reference(weights, kernels):
    return jnp.sum(kernels.astype(jnp.float32)
                   * weights.astype(jnp.float32)[:, None, None], axis=0)


if __name__ == "__main__":
    key = jax.random.PRNGKey(0)

    # --- demo shape: 4 base kernels, each a 256 x 256 similarity matrix -----
    n_kernels, N = 4, 256
    weights, kernels = init_ensemble_params(key, n_kernels, N, init_type="uniform")

    k_new = jax.block_until_ready(ensemble_kernels_forward(weights, kernels))
    ref = _reference(weights, kernels)
    assert k_new.shape == (N, N) and k_new.dtype == jnp.float32
    assert jnp.allclose(k_new, ref, atol=1e-5, rtol=1e-5)

    # --- bf16 base kernels: preferred deployment mode (halves HBM reads) ----
    k_bf16 = jax.block_until_ready(
        ensemble_kernels_forward(weights, kernels.astype(jnp.bfloat16)))
    assert jnp.allclose(k_bf16, ref, atol=5e-2, rtol=5e-2)

    # --- non-128-aligned N (exact-row blocks, masked edge row tiles) --------
    w2, k2 = init_ensemble_params(jax.random.PRNGKey(1), 3, 200, "random")
    out2 = jax.block_until_ready(ensemble_kernels_forward(w2, k2))
    assert jnp.allclose(out2, _reference(w2, k2), atol=1e-4, rtol=1e-4)

    # --- force the chunked kernel-axis (reduction-grid) path at small shape -
    w3, k3 = init_ensemble_params(jax.random.PRNGKey(2), 12, 384, "uniform")
    out3 = jax.block_until_ready(
        ensemble_kernels_forward(w3, k3,
                                 target_step_bytes=32 << 10,
                                 max_step_bytes=64 << 10))
    assert jnp.allclose(out3, _reference(w3, k3), atol=1e-4, rtol=1e-4)

    print("KERNEL_OK")
</pallas_src>

<mosaic_0001>
module attributes {stable_mosaic.version = 11 : i64} {
  func.func @_ensemble_kernel(%arg0: i32, %arg1: i32, %arg2: memref<4xf32, #tpu.memory_space<smem>>, %arg3: memref<4x128x256xf32, #tpu.memory_space<vmem>>, %arg4: memref<128x256xf32, #tpu.memory_space<vmem>>) attributes {dimension_semantics = [#tpu.dimension_semantics<parallel>, #tpu.dimension_semantics<arbitrary>], iteration_bounds = array<i64: 2, 1>, scalar_prefetch = 0 : i64, scratch_operands = 0 : i64, tpu.core_type = #tpu.core_type<tc>, window_params = [{transform_indices = @transform_0, window_bounds = array<i64: 4>}, {transform_indices = @transform_1, window_bounds = array<i64: 4, 128, 256>}, {transform_indices = @transform_2, window_bounds = array<i64: 128, 256>}]} {
    %c0 = arith.constant 0 : index
    %0 = memref.load %arg2[%c0] : memref<4xf32, #tpu.memory_space<smem>>
    %c0_0 = arith.constant 0 : index
    %c0_1 = arith.constant 0 : index
    %c0_2 = arith.constant 0 : index
    %1 = vector.load %arg3[%c0_0, %c0_1, %c0_2] : memref<4x128x256xf32, #tpu.memory_space<vmem>>, vector<1x128x256xf32>
    %2 = vector.shape_cast %1 : vector<1x128x256xf32> to vector<128x256xf32>
    %3 = vector.broadcast %0 : f32 to vector<128x256xf32>
    %4 = arith.mulf %3, %2 : vector<128x256xf32>
    %c1 = arith.constant 1 : index
    %5 = memref.load %arg2[%c1] : memref<4xf32, #tpu.memory_space<smem>>
    %c1_3 = arith.constant 1 : index
    %c0_4 = arith.constant 0 : index
    %c0_5 = arith.constant 0 : index
    %6 = vector.load %arg3[%c1_3, %c0_4, %c0_5] : memref<4x128x256xf32, #tpu.memory_space<vmem>>, vector<1x128x256xf32>
    %7 = vector.shape_cast %6 : vector<1x128x256xf32> to vector<128x256xf32>
    %8 = vector.broadcast %5 : f32 to vector<128x256xf32>
    %9 = arith.mulf %8, %7 : vector<128x256xf32>
    %10 = arith.addf %4, %9 : vector<128x256xf32>
    %c2 = arith.constant 2 : index
    %11 = memref.load %arg2[%c2] : memref<4xf32, #tpu.memory_space<smem>>
    %c2_6 = arith.constant 2 : index
    %c0_7 = arith.constant 0 : index
    %c0_8 = arith.constant 0 : index
    %12 = vector.load %arg3[%c2_6, %c0_7, %c0_8] : memref<4x128x256xf32, #tpu.memory_space<vmem>>, vector<1x128x256xf32>
    %13 = vector.shape_cast %12 : vector<1x128x256xf32> to vector<128x256xf32>
    %14 = vector.broadcast %11 : f32 to vector<128x256xf32>
    %15 = arith.mulf %14, %13 : vector<128x256xf32>
    %16 = arith.addf %10, %15 : vector<128x256xf32>
    %c3 = arith.constant 3 : index
    %17 = memref.load %arg2[%c3] : memref<4xf32, #tpu.memory_space<smem>>
    %c3_9 = arith.constant 3 : index
    %c0_10 = arith.constant 0 : index
    %c0_11 = arith.constant 0 : index
    %18 = vector.load %arg3[%c3_9, %c0_10, %c0_11] : memref<4x128x256xf32, #tpu.memory_space<vmem>>, vector<1x128x256xf32>
    %19 = vector.shape_cast %18 : vector<1x128x256xf32> to vector<128x256xf32>
    %20 = vector.broadcast %17 : f32 to vector<128x256xf32>
    %21 = arith.mulf %20, %19 : vector<128x256xf32>
    %22 = arith.addf %16, %21 : vector<128x256xf32>
    %c0_12 = arith.constant 0 : index
    %c0_13 = arith.constant 0 : index
    %23 = vector.load %arg4[%c0_12, %c0_13] : memref<128x256xf32, #tpu.memory_space<vmem>>, vector<128x256xf32>
    tpu.vector_store %arg4[%c0_12, %c0_13], %22 {strides = array<i32>} : memref<128x256xf32, #tpu.memory_space<vmem>>, vector<128x256xf32>,
    return
  }
  func.func @transform_0(%arg0: i32, %arg1: i32) -> i32 {
    %c0_i32 = arith.constant 0 : i32
    %c0_i32_0 = arith.constant 0 : i32
    return %c0_i32 : i32
  }
  func.func @transform_1(%arg0: i32, %arg1: i32) -> (i32, i32, i32) {
    %c0_i32 = arith.constant 0 : i32
    %c0_i32_0 = arith.constant 0 : i32
    return %arg1, %arg0, %c0_i32 : i32, i32, i32
  }
  func.func @transform_2(%arg0: i32, %arg1: i32) -> (i32, i32) {
    %c0_i32 = arith.constant 0 : i32
    %c0_i32_0 = arith.constant 0 : i32
    return %arg0, %c0_i32 : i32, i32
  }
}

</mosaic_0001>

<bundles_post_ra>
// kernel: tpu_custom_call.1
= control target key start
LH: loop header
LB: loop body
LE: loop exit
PB: predicated region body
PF: predicated region fallthrough
CT: control target
= control target key end

     0   :  { %7 = vsyncpa [#allocation5], 0  ;;  %s1528_s0 = inlined_call_operand.hbm [shape: f32[4], index: 0, kind: input, shape index: {}]   ;;  %s1529_s1 = inlined_call_operand.hbm [shape: f32[4,256,256], index: 1, kind: input, shape index: {}]   ;;  %s1530_s2 = inlined_call_operand.hbm [shape: f32[256,256], index: 2, kind: output, shape index: {}]  }
   0x1   :  { %8 = vsyncpa [#allocation3], 0 }
   0x2   :  { %10 = vsyncpa [#allocation3 + $0x1], 0 }
   0x3   :  { %11 = vsyncpa [#allocation4], 0 }
   0x4   :  { %13 = vsyncpa [#allocation4 + $0x1], 0  ;;  %s1050_s9 = smov 0   ;;  %s1052_s10 = smov 0  }
   0x5   :  { %s1054_s11 = smov 0   ;;  %s1056_s12 = smov 0  }
   0x6   :  { %s1058_s13 = smov 0   ;;  %s1060_s14 = smov 0  }
   0x7 LB: > { %s723_s15 = sadd.s32 4294967295, %s1024_s14   ;;  %s724_s16 = sadd.s32 4294967294, %s1024_s14   ;;  %s1024_s14 = sphi %s1060_s14, %s19_s14   ;;  %s1020_s13 = sphi %s1058_s13, %s1541_s13   ;;  %s1016_s12 = sphi %s1056_s12, %s1540_s12   ;;  %s1012_s11 = sphi %s1054_s11, %s1539_s11   ;;  %s1008_s10 = sphi %s1052_s10, %s1538_s10   ;;  %s1004_s9 = sphi %s1050_s9, %s1537_s9  }
   0x8   : > { %s31_s17 = sadd.s32 1, %s1020_s13  ;;  %s61_s18 = sadd.s32 1, %s1012_s11 }
   0x9   : > { %p33_p0 = scmp.ge.s32.totalorder %s31_s17, 2  ;;  %p68_p1 = scmp.ne.s32.totalorder %s1012_s11, %s1008_s10 }
   0xa   : > { %p69_p2 = scmp.eq.s32.totalorder %s1024_s14, 0  ;;  %p74_p3 = scmp.ne.s32.totalorder %s1008_s10, %s1004_s9 }
   0xb   : > { %s1543_s17 = smov (%p33_p0, %s31_s17), 0  ;;  %p1095_p5 = scmp.eq.s32.totalorder %s723_s15, 0 }
   0xc   : > { %p1091_p4 = por %p69_p2, %p68_p1  ;;  %s57_s21 = ssub.s32 %s1020_s13, %s1543_s17 }
   0xd   : > { %p98_p6 = scmp.eq.s32.totalorder %s723_s15, 1  ;;  %p59_p7 = scmp.eq.s32.totalorder %s57_s21, 0 }
   0xe   : > { %p1103_p8 = por %p1095_p5, %p74_p3  ;;  %p104_p10 = scmp.eq.s32.totalorder %s724_s16, 1 }
   0xf   : > { %p1107_p9 = por %p98_p6, %p68_p1  ;;  %p725_p12 = scmp.ge.s32.totalorder %s1024_s14, 1 }
  0x10   : > { %s1112_s24 = scalar_select %p59_p7, %s1012_s11, %s61_s18  }
  0x11   : > { %p1114_p11 = por %p104_p10, %p74_p3  ;;  %p111_p13 = scmp.lt.s32.totalorder %s1024_s14, 3 }
  0x12   : > { %s1026_s27 = smov [#allocation2]   ;;  %p727_p3 = scmp.ge.s32.totalorder %s1024_s14, 2 }
  0x13   : > { %p1120_p0 = pnand %p725_p12, %p111_p13 }
  0x15   : > { %p862_p2 = pneg %p1120_p0  ;;  %129 = sbr.rel (%p727_p3) target bundleno = 39 (0x27), region = 20 }
  0x17   : > { %p863_p1 = pnand %p862_p2, %p1095_p5 }
  0x19   : > { %865 = dma.hbm_to_smem (!%p863_p1), %s1528_s0, 16, %s1026_s27, [#allocation5]  }
  0x1a   : > { %s133_s30 = sand.u32 1, %s1012_s11   ;;  %s844_s4 = sshll.u32 %s1020_s13, 12 }
  0x1b   : > { %s728_s3 = sshll.u32 %s133_s30, 10  ;;  %s147_s8 = scalar_lea.hbm %s1529_s1, %s844_s4 }
  0x1c   : > { %s849_s5 = scalar_select %p1091_p4, [#allocation0], [#allocation10] }
  0x1d   : > { %s137_s16 = scalar_lea.vmem [#allocation6], %s728_s3  ;;  %s1027_s21 = smov 8192  }
  0x1e   : > { %s152_s15 = sld [smem:[%s849_s5]]   ;;  %s160_s18 = sshll.u32 %s137_s16, 4  ;;  %s161_s18 = int_to_ptr.vmem [resolvable:$true] %s160_s18 }
  0x1f   : > { %850 = sst [smem:[#allocation9]] (%p1091_p4), %s1027_s21  ;;  %s1028_s27 = smov 4096  }
  0x20   : > { %851 = sst [smem:[#allocation9 + $0x1]] (%p1091_p4), %s1028_s27  ;;  %s1029_s28 = smov 16  }
  0x21   : > { %852 = sst [smem:[#allocation9 + $0x2]] (%p1091_p4), %s1029_s28  ;;  %s1030_s29 = smov 256  }
  0x22   : > { %853 = sst [smem:[#allocation9 + $0x3]] (%p1091_p4), %s1030_s29  ;;  %s134_s5 = scalar_lea.sflag [#allocation3], %s133_s30 }
  0x23   : > { %854 = sst [smem:[#allocation9 + $0x4]] (%p1091_p4), %s1030_s29  ;;  %s1031_s6 = smov 131072  }
  0x24   : > { %s732_s4 = sshll.u32 %s152_s15, 26  ;;  %855 = sst [smem:[#allocation9 + $0x5]] (%p1091_p4), %s1029_s28 }
  0x25   : > { %s733_s3 = sadd.s32 134217728, %s732_s4 }
  0x26   : > { %856 = dma.general (%p1091_p4), %s147_s8, 16384, %s161_s18, %s134_s5, %s1031_s6, [#allocation9], %s733_s3, 0  }
  0x27 PF: > { %185 = sbr.rel (%p1120_p0) target bundleno = 134 (0x86), region = 28 }
  0x2c   : > { %991 = dma.done.wait (%p1095_p5), [#allocation5], 16  }
  0x2d   : > { %993 = vsyncadd (%p1095_p5), [#allocation5], 4294967280  ;;  %s1162_s7 = sand.u32 1, %s1008_s10  }
  0x2e   : > { %s736_s30 = sshll.u32 %s1162_s7, 10  ;;  %s192_s15 = scalar_lea.sflag [#allocation3], %s1162_s7 }
  0x2f   : > { %s1166_s19 = scalar_lea.vmem [#allocation6], %s736_s30 }
  0x30   : > { %995 = dma.done.wait (%p1103_p8), %s192_s15, 16384  }
  0x31   : > { %997 = vsyncadd (%p1103_p8), %s192_s15, 4294950912 }
  0x32   : > { %200 = sfence }
  0x33   : > { %s220_s26 = sld [smem:[#allocation2]]  ;;  %v221_v0 = vld [vmem:[%s1166_s19] sm:$0xff]  ;;  %v222_v1 = vld [vmem:[%s1166_s19 + $0x8] sm:$0xff]  ;;  %v223_v2 = vld [vmem:[%s1166_s19 + $0x10] sm:$0xff]  ;;  %s737_s22 = sshll.u32 %s1162_s7, 8 }
  0x34   : > { %s738_s20 = sld [smem:[#allocation2 + $0x1]]  ;;  %v739_v3 = vld [vmem:[%s1166_s19 + $0x100] sm:$0xff]  ;;  %v740_v4 = vld [vmem:[%s1166_s19 + $0x108] sm:$0xff]  ;;  %v741_v5 = vld [vmem:[%s1166_s19 + $0x110] sm:$0xff]  ;;  %s1234_s18 = scalar_lea.vmem [#allocation7], %s737_s22 }
  0x35   : > { %s771_s8 = sld [smem:[#allocation2 + $0x2]]  ;;  %v772_v7 = vld [vmem:[%s1166_s19 + $0x200] sm:$0xff]  ;;  %v773_v8 = vld [vmem:[%s1166_s19 + $0x208] sm:$0xff]  ;;  %v774_v9 = vld [vmem:[%s1166_s19 + $0x210] sm:$0xff]  ;;  %s846_s21 = sshll.u32 %s1016_s12, 12 }
  0x36   : > { %s804_s16 = sld [smem:[#allocation2 + $0x3]]  ;;  %v805_v12 = vld [vmem:[%s1166_s19 + $0x300] sm:$0xff]  ;;  %v806_v14 = vld [vmem:[%s1166_s19 + $0x308] sm:$0xff]  ;;  %v807_v20 = vld [vmem:[%s1166_s19 + $0x310] sm:$0xff]  ;;  %s630_s27 = sshll.u32 %s1234_s18, 4  ;;  %s1478_s27 = int_to_ptr.vmem [resolvable:$true] %s630_s27 }
  0x37   : > { %v224_v21 = vld [vmem:[%s1166_s19 + $0x18] sm:$0xff]  ;;  %v225_v33 = vld [vmem:[%s1166_s19 + $0x20] sm:$0xff]  ;;  %v226_v45 = vld [vmem:[%s1166_s19 + $0x28] sm:$0xff]  ;;  %s1476_s4 = scalar_lea.hbm %s1530_s2, %s846_s21  ;;  %s616_s12 = scalar_lea.sflag [#allocation4], %s1162_s7 }
  0x38   : > { %v742_v22 = vld [vmem:[%s1166_s19 + $0x118] sm:$0xff]  ;;  %v743_v34 = vld [vmem:[%s1166_s19 + $0x120] sm:$0xff]  ;;  %v744_v46 = vld [vmem:[%s1166_s19 + $0x128] sm:$0xff]  ;;  %s940_s3 = scalar_lea.vmem %s1478_s27, 4096  ;;  %s1032_s5 = smov [#allocation7]  }
  0x39   : > { %v1178_v6 = vstv %s220_s26  ;;  %v775_v27 = vld [vmem:[%s1166_s19 + $0x218] sm:$0xff]  ;;  %v776_v39 = vld [vmem:[%s1166_s19 + $0x220] sm:$0xff]  ;;  %v777_v51 = vld [vmem:[%s1166_s19 + $0x228] sm:$0xff]  ;;  %p941_p4 = scmp.ne.s32.totalorder %s1478_s27, %s940_s3  ;;  %s944_s6 = sshll.u32 %s1032_s5, 4  ;;  %s945_s6 = int_to_ptr.vmem [resolvable:$false] %s944_s6 }
  0x3a   : > { %v254_v10 = vmul.f32 %v1178_v6, %v221_v0  ;;  %v1184_v11 = vstv %s738_s20  ;;  %v255_v13 = vmul.f32 %v1178_v6, %v222_v1  ;;  %v256_v15 = vmul.f32 %v1178_v6, %v223_v2  ;;  %v808_v28 = vld [vmem:[%s1166_s19 + $0x318] sm:$0xff]  ;;  %v809_v40 = vld [vmem:[%s1166_s19 + $0x320] sm:$0xff]  ;;  %v810_v52 = vld [vmem:[%s1166_s19 + $0x328] sm:$0xff]  ;;  %s946_s30 = scalar_lea.vmem %s945_s6, 8192  ;;  %p947_p7 = scmp.lt.s32.totalorder %s1478_s27, %s945_s6 }
  0x3b   : > { %v321_v16 = vmul.f32 %v739_v3, %v1184_v11  ;;  %v1191_v17 = vstv %s771_s8  ;;  %v322_v18 = vmul.f32 %v740_v4, %v1184_v11  ;;  %v323_v19 = vmul.f32 %v741_v5, %v1184_v11  ;;  %v227_v53 = vld [vmem:[%s1166_s19 + $0x30] sm:$0xff]  ;;  %v228_v1 = vld [vmem:[%s1166_s19 + $0x38] sm:$0xff]  ;;  %p942_p5 = pnand %p941_p4, %p1107_p9  ;;  %p948_p8 = scmp.lt.s32.totalorder %s946_s30, %s940_s3 }
  0x3c   : > { %v420_v23 = vmul.f32 %v772_v7, %v1191_v17  ;;  %v1199_v24 = vstv %s804_s16  ;;  %v421_v25 = vmul.f32 %v773_v8, %v1191_v17  ;;  %v422_v26 = vmul.f32 %v774_v9, %v1191_v17  ;;  %v745_v58 = vld [vmem:[%s1166_s19 + $0x130] sm:$0xff]  ;;  %v746_v2 = vld [vmem:[%s1166_s19 + $0x138] sm:$0xff] }
  0x3d   : > { %v353_v29 = vadd.f32 %v321_v16, %v254_v10  ;;  %v519_v30 = vmul.f32 %v805_v12, %v1199_v24  ;;  %v354_v31 = vadd.f32 %v322_v18, %v255_v13  ;;  %v520_v32 = vmul.f32 %v806_v14, %v1199_v24  ;;  %v778_v59 = vld [vmem:[%s1166_s19 + $0x230] sm:$0xff]  ;;  %v779_v8 = vld [vmem:[%s1166_s19 + $0x238] sm:$0xff]  ;;  %v747_v16 = vld [vmem:[%s1166_s19 + $0x140] sm:$0xff]  ;;  %p943_p6 = pneg %p942_p5  ;;  %p949_p10 = por %p948_p8, %p947_p7 }
  0x3e   : > { %v355_v35 = vadd.f32 %v323_v19, %v256_v15  ;;  %v521_v36 = vmul.f32 %v807_v20, %v1199_v24  ;;  %v257_v37 = vmul.f32 %v1178_v6, %v224_v21  ;;  %v324_v38 = vmul.f32 %v742_v22, %v1184_v11  ;;  %v811_v0 = vld [vmem:[%s1166_s19 + $0x330] sm:$0xff]  ;;  %v812_v9 = vld [vmem:[%s1166_s19 + $0x338] sm:$0xff]  ;;  %v229_v15 = vld [vmem:[%s1166_s19 + $0x40] sm:$0xff] }
  0x3f   : > { %v452_v41 = vadd.f32 %v420_v23, %v353_v29  ;;  %v453_v42 = vadd.f32 %v421_v25, %v354_v31  ;;  %v423_v43 = vmul.f32 %v775_v27, %v1191_v17  ;;  %v522_v44 = vmul.f32 %v808_v28, %v1199_v24  ;;  %v780_v22 = vld [vmem:[%s1166_s19 + $0x240] sm:$0xff]  ;;  %v230_v25 = vld [vmem:[%s1166_s19 + $0x48] sm:$0xff]  ;;  %p950_p12 = pnand %p949_p10, %p943_p6 }
  0x40   : > { %v454_v47 = vadd.f32 %v422_v26, %v355_v35  ;;  %v356_v48 = vadd.f32 %v324_v38, %v257_v37  ;;  %v258_v49 = vmul.f32 %v1178_v6, %v225_v33  ;;  %v325_v50 = vmul.f32 %v743_v34, %v1184_v11  ;;  %v813_v23 = vld [vmem:[%s1166_s19 + $0x340] sm:$0xff]  ;;  %v781_v35 = vld [vmem:[%s1166_s19 + $0x248] sm:$0xff]  ;;  %v231_v37 = vld [vmem:[%s1166_s19 + $0x50] sm:$0xff] }
  0x41   : > { %v551_v54 = vadd.f32 %v519_v30, %v452_v41  ;;  %v552_v55 = vadd.f32 %v520_v32, %v453_v42  ;;  %v424_v56 = vmul.f32 %v776_v39, %v1191_v17  ;;  %v523_v57 = vmul.f32 %v809_v40, %v1199_v24  ;;  %v748_v30 = vld [vmem:[%s1166_s19 + $0x148] sm:$0xff]  ;;  %v749_v42 = vld [vmem:[%s1166_s19 + $0x150] sm:$0xff] }
  0x42   : > { %v553_v60 = vadd.f32 %v521_v36, %v454_v47  ;;  %v455_v61 = vadd.f32 %v423_v43, %v356_v48  ;;  %v357_v62 = vadd.f32 %v325_v50, %v258_v49  ;;  %v259_v63 = vmul.f32 %v1178_v6, %v226_v45  ;;  %v814_v36 = vld [vmem:[%s1166_s19 + $0x348] sm:$0xff]  ;;  %v782_v43 = vld [vmem:[%s1166_s19 + $0x250] sm:$0xff]  ;;  %v232_v49 = vld [vmem:[%s1166_s19 + $0x58] sm:$0xff] }
  0x43   : > { %583 = vst [vmem:[%s1234_s18] sm:$0xff] %v551_v54  ;;  %584 = vst [vmem:[%s1234_s18 + $0x8] sm:$0xff] %v552_v55  ;;  %v326_v3 = vmul.f32 %v744_v46, %v1184_v11  ;;  %v425_v4 = vmul.f32 %v777_v51, %v1191_v17  ;;  %v524_v5 = vmul.f32 %v810_v52, %v1199_v24  ;;  %v815_v48 = vld [vmem:[%s1166_s19 + $0x350] sm:$0xff]  ;;  %v750_v50 = vld [vmem:[%s1166_s19 + $0x158] sm:$0xff] }
  0x44   : > { %v260_v7 = vmul.f32 %v1178_v6, %v227_v53  ;;  %585 = vst [vmem:[%s1234_s18 + $0x10] sm:$0xff] %v553_v60  ;;  %v554_v10 = vadd.f32 %v522_v44, %v455_v61  ;;  %v456_v12 = vadd.f32 %v424_v56, %v357_v62  ;;  %v327_v13 = vmul.f32 %v745_v58, %v1184_v11  ;;  %v783_v55 = vld [vmem:[%s1166_s19 + $0x258] sm:$0xff]  ;;  %v233_v61 = vld [vmem:[%s1166_s19 + $0x60] sm:$0xff] }
  0x45   : > { %v426_v14 = vmul.f32 %v778_v59, %v1191_v17  ;;  %v358_v18 = vadd.f32 %v326_v3, %v259_v63  ;;  %v525_v19 = vmul.f32 %v811_v0, %v1199_v24  ;;  %v261_v20 = vmul.f32 %v1178_v6, %v228_v1  ;;  %v816_v60 = vld [vmem:[%s1166_s19 + $0x358] sm:$0xff]  ;;  %v751_v62 = vld [vmem:[%s1166_s19 + $0x160] sm:$0xff] }
  0x46   : > { %v328_v21 = vmul.f32 %v746_v2, %v1184_v11  ;;  %586 = vst [vmem:[%s1234_s18 + $0x18] sm:$0xff] %v554_v10  ;;  %v555_v26 = vadd.f32 %v523_v57, %v456_v12  ;;  %v359_v27 = vadd.f32 %v327_v13, %v260_v7  ;;  %v427_v28 = vmul.f32 %v779_v8, %v1191_v17  ;;  %v784_v3 = vld [vmem:[%s1166_s19 + $0x260] sm:$0xff]  ;;  %v234_v10 = vld [vmem:[%s1166_s19 + $0x68] sm:$0xff] }
  0x47   : > { %v526_v29 = vmul.f32 %v812_v9, %v1199_v24  ;;  %v457_v31 = vadd.f32 %v425_v4, %v358_v18  ;;  %v262_v33 = vmul.f32 %v1178_v6, %v229_v15  ;;  %v329_v34 = vmul.f32 %v747_v16, %v1184_v11  ;;  %v817_v4 = vld [vmem:[%s1166_s19 + $0x360] sm:$0xff]  ;;  %v752_v12 = vld [vmem:[%s1166_s19 + $0x168] sm:$0xff] }
  0x48   : > { %v360_v32 = vadd.f32 %v328_v21, %v261_v20  ;;  %587 = vst [vmem:[%s1234_s18 + $0x20] sm:$0xff] %v555_v26  ;;  %v458_v38 = vadd.f32 %v426_v14, %v359_v27  ;;  %v428_v39 = vmul.f32 %v780_v22, %v1191_v17  ;;  %v527_v40 = vmul.f32 %v813_v23, %v1199_v24  ;;  %v785_v18 = vld [vmem:[%s1166_s19 + $0x268] sm:$0xff]  ;;  %v235_v20 = vld [vmem:[%s1166_s19 + $0x70] sm:$0xff] }
  0x49   : > { %v263_v41 = vmul.f32 %v1178_v6, %v230_v25  ;;  %v556_v44 = vadd.f32 %v524_v5, %v457_v31  ;;  %v361_v46 = vadd.f32 %v329_v34, %v262_v33  ;;  %v330_v47 = vmul.f32 %v748_v30, %v1184_v11  ;;  %v753_v26 = vld [vmem:[%s1166_s19 + $0x170] sm:$0xff]  ;;  %v236_v33 = vld [vmem:[%s1166_s19 + $0x78] sm:$0xff] }
  0x4a   : > { %v459_v45 = vadd.f32 %v427_v28, %v360_v32  ;;  %v557_v51 = vadd.f32 %v525_v19, %v458_v38  ;;  %v429_v52 = vmul.f32 %v781_v35, %v1191_v17  ;;  %v528_v53 = vmul.f32 %v814_v36, %v1199_v24  ;;  %v818_v19 = vld [vmem:[%s1166_s19 + $0x368] sm:$0xff]  ;;  %v786_v27 = vld [vmem:[%s1166_s19 + $0x270] sm:$0xff]  ;;  %v754_v34 = vld [vmem:[%s1166_s19 + $0x178] sm:$0xff] }
  0x4b   : > { %v264_v54 = vmul.f32 %v1178_v6, %v231_v37  ;;  %588 = vst [vmem:[%s1234_s18 + $0x28] sm:$0xff] %v556_v44  ;;  %v460_v57 = vadd.f32 %v428_v39, %v361_v46  ;;  %v362_v58 = vadd.f32 %v330_v47, %v263_v41  ;;  %v331_v59 = vmul.f32 %v749_v42, %v1184_v11  ;;  %v819_v32 = vld [vmem:[%s1166_s19 + $0x370] sm:$0xff]  ;;  %v787_v39 = vld [vmem:[%s1166_s19 + $0x278] sm:$0xff]  ;;  %v755_v46 = vld [vmem:[%s1166_s19 + $0x180] sm:$0xff] }
  0x4c   : > { %v558_v56 = vadd.f32 %v526_v29, %v459_v45  ;;  %589 = vst [vmem:[%s1234_s18 + $0x30] sm:$0xff] %v557_v51  ;;  %v430_v63 = vmul.f32 %v782_v43, %v1191_v17  ;;  %v529_v0 = vmul.f32 %v815_v48, %v1199_v24  ;;  %v265_v1 = vmul.f32 %v1178_v6, %v232_v49  ;;  %v820_v44 = vld [vmem:[%s1166_s19 + $0x378] sm:$0xff]  ;;  %v237_v45 = vld [vmem:[%s1166_s19 + $0x80] sm:$0xff] }
  0x4d   : > { %v332_v2 = vmul.f32 %v750_v50, %v1184_v11  ;;  %v559_v5 = vadd.f32 %v527_v40, %v460_v57  ;;  %v461_v7 = vadd.f32 %v429_v52, %v362_v58  ;;  %v363_v8 = vadd.f32 %v331_v59, %v264_v54  ;;  %v788_v51 = vld [vmem:[%s1166_s19 + $0x280] sm:$0xff]  ;;  %v238_v57 = vld [vmem:[%s1166_s19 + $0x88] sm:$0xff] }
  0x4e   : > { %590 = vst [vmem:[%s1234_s18 + $0x38] sm:$0xff] %v558_v56  ;;  %v431_v9 = vmul.f32 %v783_v55, %v1191_v17  ;;  %v530_v14 = vmul.f32 %v816_v60, %v1199_v24  ;;  %v266_v15 = vmul.f32 %v1178_v6, %v233_v61  ;;  %v333_v16 = vmul.f32 %v751_v62, %v1184_v11  ;;  %v821_v52 = vld [vmem:[%s1166_s19 + $0x380] sm:$0xff]  ;;  %v756_v58 = vld [vmem:[%s1166_s19 + $0x188] sm:$0xff] }
  0x4f   : > { %v364_v13 = vadd.f32 %v332_v2, %v265_v1  ;;  %591 = vst [vmem:[%s1234_s18 + $0x40] sm:$0xff] %v559_v5  ;;  %v560_v21 = vadd.f32 %v528_v53, %v461_v7  ;;  %v462_v22 = vadd.f32 %v430_v63, %v363_v8  ;;  %v432_v23 = vmul.f32 %v784_v3, %v1191_v17  ;;  %v789_v63 = vld [vmem:[%s1166_s19 + $0x288] sm:$0xff]  ;;  %v239_v1 = vld [vmem:[%s1166_s19 + $0x90] sm:$0xff] }
  0x50   : > { %v531_v25 = vmul.f32 %v817_v4, %v1199_v24  ;;  %v365_v29 = vadd.f32 %v333_v16, %v266_v15  ;;  %v267_v30 = vmul.f32 %v1178_v6, %v234_v10  ;;  %v334_v31 = vmul.f32 %v752_v12, %v1184_v11  ;;  %v757_v7 = vld [vmem:[%s1166_s19 + $0x190] sm:$0xff]  ;;  %v240_v15 = vld [vmem:[%s1166_s19 + $0x98] sm:$0xff] }
  0x51   : > { %v463_v28 = vadd.f32 %v431_v9, %v364_v13  ;;  %592 = vst [vmem:[%s1234_s18 + $0x48] sm:$0xff] %v560_v21  ;;  %v561_v35 = vadd.f32 %v529_v0, %v462_v22  ;;  %v433_v36 = vmul.f32 %v785_v18, %v1191_v17  ;;  %v532_v37 = vmul.f32 %v818_v19, %v1199_v24  ;;  %v822_v0 = vld [vmem:[%s1166_s19 + $0x388] sm:$0xff]  ;;  %v790_v8 = vld [vmem:[%s1166_s19 + $0x290] sm:$0xff]  ;;  %v758_v16 = vld [vmem:[%s1166_s19 + $0x198] sm:$0xff] }
  0x52   : > { %v268_v38 = vmul.f32 %v1178_v6, %v235_v20  ;;  %v464_v41 = vadd.f32 %v432_v23, %v365_v29  ;;  %v366_v42 = vadd.f32 %v334_v31, %v267_v30  ;;  %v335_v43 = vmul.f32 %v753_v26, %v1184_v11  ;;  %v791_v22 = vld [vmem:[%s1166_s19 + $0x298] sm:$0xff]  ;;  %v241_v29 = vld [vmem:[%s1166_s19 + $0xa0] sm:$0xff] }
  0x53   : > { %v562_v40 = vadd.f32 %v530_v14, %v463_v28  ;;  %593 = vst [vmem:[%s1234_s18 + $0x50] sm:$0xff] %v561_v35  ;;  %v434_v47 = vmul.f32 %v786_v27, %v1191_v17  ;;  %v533_v48 = vmul.f32 %v819_v32, %v1199_v24  ;;  %v269_v49 = vmul.f32 %v1178_v6, %v236_v33  ;;  %v823_v14 = vld [vmem:[%s1166_s19 + $0x390] sm:$0xff]  ;;  %v824_v28 = vld [vmem:[%s1166_s19 + $0x398] sm:$0xff]  ;;  %v759_v30 = vld [vmem:[%s1166_s19 + $0x1a0] sm:$0xff] }
  0x54   : > { %v336_v50 = vmul.f32 %v754_v34, %v1184_v11  ;;  %v563_v53 = vadd.f32 %v531_v25, %v464_v41  ;;  %v465_v54 = vadd.f32 %v433_v36, %v366_v42  ;;  %v367_v55 = vadd.f32 %v335_v43, %v268_v38  ;;  %v792_v35 = vld [vmem:[%s1166_s19 + $0x2a0] sm:$0xff]  ;;  %v242_v41 = vld [vmem:[%s1166_s19 + $0xa8] sm:$0xff] }
  0x55   : > { %594 = vst [vmem:[%s1234_s18 + $0x58] sm:$0xff] %v562_v40  ;;  %v435_v56 = vmul.f32 %v787_v39, %v1191_v17  ;;  %v534_v60 = vmul.f32 %v820_v44, %v1199_v24  ;;  %v270_v61 = vmul.f32 %v1178_v6, %v237_v45  ;;  %v337_v62 = vmul.f32 %v755_v46, %v1184_v11  ;;  %v825_v36 = vld [vmem:[%s1166_s19 + $0x3a0] sm:$0xff]  ;;  %v760_v42 = vld [vmem:[%s1166_s19 + $0x1a8] sm:$0xff] }
  0x56   : > { %v368_v59 = vadd.f32 %v336_v50, %v269_v49  ;;  %595 = vst [vmem:[%s1234_s18 + $0x60] sm:$0xff] %v563_v53  ;;  %v564_v2 = vadd.f32 %v532_v37, %v465_v54  ;;  %v466_v3 = vadd.f32 %v434_v47, %v367_v55  ;;  %v436_v4 = vmul.f32 %v788_v51, %v1191_v17  ;;  %v793_v47 = vld [vmem:[%s1166_s19 + $0x2a8] sm:$0xff]  ;;  %v243_v49 = vld [vmem:[%s1166_s19 + $0xb0] sm:$0xff] }
  0x57   : > { %v535_v5 = vmul.f32 %v821_v52, %v1199_v24  ;;  %v369_v10 = vadd.f32 %v337_v62, %v270_v61  ;;  %v271_v12 = vmul.f32 %v1178_v6, %v238_v57  ;;  %v338_v13 = vmul.f32 %v756_v58, %v1184_v11  ;;  %v761_v54 = vld [vmem:[%s1166_s19 + $0x1b0] sm:$0xff]  ;;  %v244_v61 = vld [vmem:[%s1166_s19 + $0xb8] sm:$0xff] }
  0x58   : > { %v467_v9 = vadd.f32 %v435_v56, %v368_v59  ;;  %596 = vst [vmem:[%s1234_s18 + $0x68] sm:$0xff] %v564_v2  ;;  %v565_v18 = vadd.f32 %v533_v48, %v466_v3  ;;  %v437_v19 = vmul.f32 %v789_v63, %v1191_v17  ;;  %v536_v20 = vmul.f32 %v822_v0, %v1199_v24  ;;  %v826_v48 = vld [vmem:[%s1166_s19 + $0x3a8] sm:$0xff]  ;;  %v794_v55 = vld [vmem:[%s1166_s19 + $0x2b0] sm:$0xff]  ;;  %v762_v62 = vld [vmem:[%s1166_s19 + $0x1b8] sm:$0xff] }
  0x59   : > { %v272_v21 = vmul.f32 %v1178_v6, %v239_v1  ;;  %v468_v25 = vadd.f32 %v436_v4, %v369_v10  ;;  %v370_v26 = vadd.f32 %v338_v13, %v271_v12  ;;  %v339_v27 = vmul.f32 %v757_v7, %v1184_v11  ;;  %v795_v3 = vld [vmem:[%s1166_s19 + $0x2b8] sm:$0xff]  ;;  %v245_v10 = vld [vmem:[%s1166_s19 + $0xc0] sm:$0xff] }
  0x5a   : > { %v566_v23 = vadd.f32 %v534_v60, %v467_v9  ;;  %597 = vst [vmem:[%s1234_s18 + $0x70] sm:$0xff] %v565_v18  ;;  %v438_v31 = vmul.f32 %v790_v8, %v1191_v17  ;;  %v537_v32 = vmul.f32 %v823_v14, %v1199_v24  ;;  %v273_v33 = vmul.f32 %v1178_v6, %v240_v15  ;;  %v827_v60 = vld [vmem:[%s1166_s19 + $0x3b0] sm:$0xff]  ;;  %v828_v9 = vld [vmem:[%s1166_s19 + $0x3b8] sm:$0xff]  ;;  %v763_v12 = vld [vmem:[%s1166_s19 + $0x1c0] sm:$0xff] }
  0x5b   : > { %v340_v34 = vmul.f32 %v758_v16, %v1184_v11  ;;  %v567_v37 = vadd.f32 %v535_v5, %v468_v25  ;;  %v469_v38 = vadd.f32 %v437_v19, %v370_v26  ;;  %v371_v39 = vadd.f32 %v339_v27, %v272_v21  ;;  %v796_v18 = vld [vmem:[%s1166_s19 + $0x2c0] sm:$0xff]  ;;  %v246_v25 = vld [vmem:[%s1166_s19 + $0xc8] sm:$0xff] }
  0x5c   : > { %598 = vst [vmem:[%s1234_s18 + $0x78] sm:$0xff] %v566_v23  ;;  %v439_v40 = vmul.f32 %v791_v22, %v1191_v17  ;;  %v538_v44 = vmul.f32 %v824_v28, %v1199_v24  ;;  %v274_v45 = vmul.f32 %v1178_v6, %v241_v29  ;;  %v341_v46 = vmul.f32 %v759_v30, %v1184_v11  ;;  %v829_v19 = vld [vmem:[%s1166_s19 + $0x3c0] sm:$0xff]  ;;  %v764_v26 = vld [vmem:[%s1166_s19 + $0x1c8] sm:$0xff] }
  0x5d   : > { %v372_v43 = vadd.f32 %v340_v34, %v273_v33  ;;  %599 = vst [vmem:[%s1234_s18 + $0x80] sm:$0xff] %v567_v37  ;;  %v568_v50 = vadd.f32 %v536_v20, %v469_v38  ;;  %v470_v51 = vadd.f32 %v438_v31, %v371_v39  ;;  %v440_v52 = vmul.f32 %v792_v35, %v1191_v17  ;;  %v797_v31 = vld [vmem:[%s1166_s19 + $0x2c8] sm:$0xff]  ;;  %v247_v33 = vld [vmem:[%s1166_s19 + $0xd0] sm:$0xff] }
  0x5e   : > { %v539_v53 = vmul.f32 %v825_v36, %v1199_v24  ;;  %v373_v57 = vadd.f32 %v341_v46, %v274_v45  ;;  %v275_v58 = vmul.f32 %v1178_v6, %v242_v41  ;;  %v342_v59 = vmul.f32 %v760_v42, %v1184_v11  ;;  %v765_v38 = vld [vmem:[%s1166_s19 + $0x1d0] sm:$0xff]  ;;  %v248_v45 = vld [vmem:[%s1166_s19 + $0xd8] sm:$0xff] }
  0x5f   : > { %v471_v56 = vadd.f32 %v439_v40, %v372_v43  ;;  %600 = vst [vmem:[%s1234_s18 + $0x88] sm:$0xff] %v568_v50  ;;  %v569_v63 = vadd.f32 %v537_v32, %v470_v51  ;;  %v441_v0 = vmul.f32 %v793_v47, %v1191_v17  ;;  %v540_v1 = vmul.f32 %v826_v48, %v1199_v24  ;;  %v830_v32 = vld [vmem:[%s1166_s19 + $0x3c8] sm:$0xff]  ;;  %v798_v39 = vld [vmem:[%s1166_s19 + $0x2d0] sm:$0xff]  ;;  %v766_v46 = vld [vmem:[%s1166_s19 + $0x1d8] sm:$0xff] }
  0x60   : > { %v276_v2 = vmul.f32 %v1178_v6, %v243_v49  ;;  %v472_v5 = vadd.f32 %v440_v52, %v373_v57  ;;  %v374_v7 = vadd.f32 %v342_v59, %v275_v58  ;;  %v343_v8 = vmul.f32 %v761_v54, %v1184_v11  ;;  %v799_v51 = vld [vmem:[%s1166_s19 + $0x2d8] sm:$0xff]  ;;  %v249_v57 = vld [vmem:[%s1166_s19 + $0xe0] sm:$0xff] }
  0x61   : > { %v570_v4 = vadd.f32 %v538_v44, %v471_v56  ;;  %601 = vst [vmem:[%s1234_s18 + $0x90] sm:$0xff] %v569_v63  ;;  %v442_v13 = vmul.f32 %v794_v55, %v1191_v17  ;;  %v541_v14 = vmul.f32 %v827_v60, %v1199_v24  ;;  %v277_v15 = vmul.f32 %v1178_v6, %v244_v61  ;;  %v831_v44 = vld [vmem:[%s1166_s19 + $0x3d0] sm:$0xff]  ;;  %v832_v56 = vld [vmem:[%s1166_s19 + $0x3d8] sm:$0xff]  ;;  %v767_v58 = vld [vmem:[%s1166_s19 + $0x1e0] sm:$0xff] }
  0x62   : > { %v344_v16 = vmul.f32 %v762_v62, %v1184_v11  ;;  %v571_v20 = vadd.f32 %v539_v53, %v472_v5  ;;  %v473_v21 = vadd.f32 %v441_v0, %v374_v7  ;;  %v375_v22 = vadd.f32 %v343_v8, %v276_v2  ;;  %v800_v63 = vld [vmem:[%s1166_s19 + $0x2e0] sm:$0xff]  ;;  %v250_v5 = vld [vmem:[%s1166_s19 + $0xe8] sm:$0xff] }
  0x63   : > { %602 = vst [vmem:[%s1234_s18 + $0x98] sm:$0xff] %v570_v4  ;;  %v443_v23 = vmul.f32 %v795_v3, %v1191_v17  ;;  %v542_v28 = vmul.f32 %v828_v9, %v1199_v24  ;;  %v278_v29 = vmul.f32 %v1178_v6, %v245_v10  ;;  %v345_v30 = vmul.f32 %v763_v12, %v1184_v11  ;;  %v833_v0 = vld [vmem:[%s1166_s19 + $0x3e0] sm:$0xff]  ;;  %v768_v7 = vld [vmem:[%s1166_s19 + $0x1e8] sm:$0xff] }
  0x64   : > { %v376_v27 = vadd.f32 %v344_v16, %v277_v15  ;;  %603 = vst [vmem:[%s1234_s18 + $0xa0] sm:$0xff] %v571_v20  ;;  %v572_v34 = vadd.f32 %v540_v1, %v473_v21  ;;  %v474_v35 = vadd.f32 %v442_v13, %v375_v22  ;;  %v444_v36 = vmul.f32 %v796_v18, %v1191_v17  ;;  %v801_v13 = vld [vmem:[%s1166_s19 + $0x2e8] sm:$0xff]  ;;  %v251_v15 = vld [vmem:[%s1166_s19 + $0xf0] sm:$0xff] }
  0x65   : > { %v543_v37 = vmul.f32 %v829_v19, %v1199_v24  ;;  %v377_v41 = vadd.f32 %v345_v30, %v278_v29  ;;  %v279_v42 = vmul.f32 %v1178_v6, %v246_v25  ;;  %v346_v43 = vmul.f32 %v764_v26, %v1184_v11  ;;  %v769_v21 = vld [vmem:[%s1166_s19 + $0x1f0] sm:$0xff]  ;;  %v252_v29 = vld [vmem:[%s1166_s19 + $0xf8] sm:$0xff] }
  0x66   : > { %v475_v40 = vadd.f32 %v443_v23, %v376_v27  ;;  %604 = vst [vmem:[%s1234_s18 + $0xa8] sm:$0xff] %v572_v34  ;;  %v573_v47 = vadd.f32 %v541_v14, %v474_v35  ;;  %v445_v48 = vmul.f32 %v797_v31, %v1191_v17  ;;  %v544_v49 = vmul.f32 %v830_v32, %v1199_v24  ;;  %v834_v14 = vld [vmem:[%s1166_s19 + $0x3e8] sm:$0xff]  ;;  %v802_v22 = vld [vmem:[%s1166_s19 + $0x2f0] sm:$0xff]  ;;  %v770_v30 = vld [vmem:[%s1166_s19 + $0x1f8] sm:$0xff] }
  0x67   : > { %v280_v50 = vmul.f32 %v1178_v6, %v247_v33  ;;  %v476_v53 = vadd.f32 %v444_v36, %v377_v41  ;;  %v378_v54 = vadd.f32 %v346_v43, %v279_v42  ;;  %v347_v55 = vmul.f32 %v765_v38, %v1184_v11  ;;  %v803_v35 = vld [vmem:[%s1166_s19 + $0x2f8] sm:$0xff] }
  0x68   : > { %v574_v52 = vadd.f32 %v542_v28, %v475_v40  ;;  %605 = vst [vmem:[%s1234_s18 + $0xb0] sm:$0xff] %v573_v47  ;;  %v446_v59 = vmul.f32 %v798_v39, %v1191_v17  ;;  %v545_v60 = vmul.f32 %v831_v44, %v1199_v24  ;;  %v281_v61 = vmul.f32 %v1178_v6, %v248_v45  ;;  %v835_v28 = vld [vmem:[%s1166_s19 + $0x3f0] sm:$0xff]  ;;  %v836_v40 = vld [vmem:[%s1166_s19 + $0x3f8] sm:$0xff] }
  0x69   : > { %v348_v62 = vmul.f32 %v766_v46, %v1184_v11  ;;  %v575_v1 = vadd.f32 %v543_v37, %v476_v53  ;;  %v477_v2 = vadd.f32 %v445_v48, %v378_v54  ;;  %v379_v3 = vadd.f32 %v347_v55, %v280_v50 }
  0x6a   : > { %606 = vst [vmem:[%s1234_s18 + $0xb8] sm:$0xff] %v574_v52  ;;  %v447_v4 = vmul.f32 %v799_v51, %v1191_v17  ;;  %v546_v9 = vmul.f32 %v832_v56, %v1199_v24  ;;  %v282_v10 = vmul.f32 %v1178_v6, %v249_v57  ;;  %v349_v12 = vmul.f32 %v767_v58, %v1184_v11 }
  0x6b   : > { %v380_v8 = vadd.f32 %v348_v62, %v281_v61  ;;  %607 = vst [vmem:[%s1234_s18 + $0xc0] sm:$0xff] %v575_v1  ;;  %v576_v16 = vadd.f32 %v544_v49, %v477_v2  ;;  %v478_v18 = vadd.f32 %v446_v59, %v379_v3  ;;  %v448_v19 = vmul.f32 %v800_v63, %v1191_v17 }
  0x6c   : > { %v547_v20 = vmul.f32 %v833_v0, %v1199_v24  ;;  %v381_v25 = vadd.f32 %v349_v12, %v282_v10  ;;  %v283_v26 = vmul.f32 %v1178_v6, %v250_v5  ;;  %v350_v27 = vmul.f32 %v768_v7, %v1184_v11 }
  0x6d   : > { %v479_v23 = vadd.f32 %v447_v4, %v380_v8  ;;  %608 = vst [vmem:[%s1234_s18 + $0xc8] sm:$0xff] %v576_v16  ;;  %v577_v31 = vadd.f32 %v545_v60, %v478_v18  ;;  %v449_v32 = vmul.f32 %v801_v13, %v1191_v17  ;;  %v548_v33 = vmul.f32 %v834_v14, %v1199_v24 }
  0x6e   : > { %v284_v34 = vmul.f32 %v1178_v6, %v251_v15  ;;  %v480_v37 = vadd.f32 %v448_v19, %v381_v25  ;;  %v382_v38 = vadd.f32 %v350_v27, %v283_v26  ;;  %v351_v39 = vmul.f32 %v769_v21, %v1184_v11 }
  0x6f   : > { %v578_v36 = vadd.f32 %v546_v9, %v479_v23  ;;  %609 = vst [vmem:[%s1234_s18 + $0xd0] sm:$0xff] %v577_v31  ;;  %v450_v41 = vmul.f32 %v802_v22, %v1191_v17  ;;  %v549_v42 = vmul.f32 %v835_v28, %v1199_v24  ;;  %v285_v43 = vmul.f32 %v1178_v6, %v252_v29 }
  0x70   : > { %v352_v44 = vmul.f32 %v770_v30, %v1184_v11  ;;  %v579_v45 = vadd.f32 %v547_v20, %v480_v37  ;;  %v481_v46 = vadd.f32 %v449_v32, %v382_v38  ;;  %v383_v47 = vadd.f32 %v351_v39, %v284_v34 }
  0x71   : > { %610 = vst [vmem:[%s1234_s18 + $0xd8] sm:$0xff] %v578_v36  ;;  %v451_v48 = vmul.f32 %v803_v35, %v1191_v17  ;;  %v550_v50 = vmul.f32 %v836_v40, %v1199_v24 }
  0x72   : > { %v384_v49 = vadd.f32 %v352_v44, %v285_v43  ;;  %611 = vst [vmem:[%s1234_s18 + $0xe0] sm:$0xff] %v579_v45  ;;  %v580_v51 = vadd.f32 %v548_v33, %v481_v46  ;;  %v482_v6 = vadd.f32 %v450_v41, %v383_v47 }
  0x74   : > { %v483_v52 = vadd.f32 %v451_v48, %v384_v49  ;;  %612 = vst [vmem:[%s1234_s18 + $0xe8] sm:$0xff] %v580_v51  ;;  %v581_v11 = vadd.f32 %v549_v42, %v482_v6 }
  0x76   : > { %v582_v17 = vadd.f32 %v550_v50, %v483_v52  ;;  %613 = vst [vmem:[%s1234_s18 + $0xf0] sm:$0xff] %v581_v11 }
  0x78   : > { %614 = vst [vmem:[%s1234_s18 + $0xf8] sm:$0xff] %v582_v17 }
  0x79   : > { %953 = shalt.err (!%p950_p12)
}
  0x7a   : > { %s954_s15 = scalar_lea.hbm %s1476_s4, 4096  ;;  %s958_s20 = scalar_lea.hbm %s1530_s2, 8192 }
  0x7b   : > { %p955_p13 = scmp.ne.s32.totalorder %s1476_s4, %s954_s15  ;;  %p959_p1 = scmp.lt.s32.totalorder %s1476_s4, %s1530_s2 }
  0x7c   : > { %p960_p4 = scmp.lt.s32.totalorder %s958_s20, %s954_s15 }
  0x7d   : > { %p956_p0 = pnand %p955_p13, %p1107_p9 }
  0x7e   : > { %p961_p5 = por %p960_p4, %p959_p1 }
  0x7f   : > { %p957_p2 = pneg %p956_p0 }
  0x81   : > { %p962_p6 = pnand %p961_p5, %p957_p2 }
  0x83   : > { %965 = shalt.err (!%p962_p6)
}
  0x84   : > { %s1033_s22 = smov 256   ;;  %s1034_s18 = smov 16  }
  0x85   : > { %860 = dma.vmem_to_hbm [thread:$0]  (%p1107_p9), %s1478_s27, 4096, %s1476_s4, %s616_s12, %s1033_s22, %s1033_s22, %s1034_s18  }
  0x86 PF: > { %s645_s21 = sand.u32 1, %s1004_s9   ;;  %p867_p7 = pnand %p727_p3, %p1114_p11 }
  0x87   : > { %s646_s28 = scalar_lea.sflag [#allocation4], %s645_s21 }
  0x88   : > { %p868_p8 = pneg %p867_p7 }
  0x8a   : > { %999 = dma.done.wait (%p868_p8), %s646_s28, 4096  }
  0x8b   : > { %1001 = vsyncadd (%p868_p8), %s646_s28, 4294963200  ;;  %s19_s14 = sadd.s32 1, %s1024_s14   ;;  %s1537_s9 = smov %s1008_s10 }
  0x8c   : > { %p16_p10 = scmp.ge.s32.totalorder %s19_s14, 4   ;;  %s1538_s10 = smov %s1012_s11 }
  0x8d   : > { %s1539_s11 = smov %s1112_s24  ;;  %s1540_s12 = smov %s1020_s13 }
  0x8e   : > { %s1541_s13 = smov %s1543_s17  ;;  %18 = sbr.rel (!%p16_p10) target bundleno = 7 (0x7), region = 86 }
  0x93   :  { %651 = vsyncpa [#allocation3], 1 }
  0x94   :  { %653 = vsyncpa [#allocation3 + $0x1], 1 }
  0x95   :  { %654 = vsyncpa [#allocation4], 1 }
  0x96   :  { %656 = vsyncpa [#allocation4 + $0x1], 1 }
  0x97   :  { %657 = vsyncpa [#allocation5], 1 }
  0x98   :  { %659 = vsyncpa [#allocation5 + $0x1], 1 }

</bundles_post_ra>
